<compile_context>
chip_gen: v7x
topology: tpu7x:2x2x1
jax: 0.10.0
libtpu: 0.0.40
codegen_flags: <defaults>
</compile_context>

<pallas_src>
import jax
import jax.numpy as jnp
from jax.experimental import pallas as pl
from jax.experimental.pallas import tpu as pltpu


def _netlin_kernel(w_ref, x_ref, o_ref):
    # w_ref: (C_out, C_in, 1) VMEM   (tiny, resident across the whole grid)
    # x_ref: (N_blk, C_in, TILE_HW) VMEM
    # o_ref: (N_blk, C_out, TILE_HW) VMEM
    x = x_ref[...].astype(jnp.float32)
    c_out = o_ref.shape[1]
    for co in range(c_out):  # static Python loop; c_out == 1 for NetLinLayer
        w_co = w_ref[co:co + 1, :, :].astype(jnp.float32)        # (1, C_in, 1)
        # Exact-f32 VPU multiply + channel (sublane-axis) reduce — no MXU.
        o_ref[:, co:co + 1, :] = jnp.sum(
            w_co * x, axis=1, keepdims=True
        ).astype(o_ref.dtype)


def _choose_tiles(n, c_in, c_out, hw, elem_bytes, target_bytes=8 << 20):
    """Pick (n_blk, tile_hw) so one grid step moves ~target_bytes of in+out."""
    bytes_per_col = max(1, (c_in + c_out) * elem_bytes)
    budget_cols = max(128, target_bytes // bytes_per_col)
    if hw <= budget_cols:
        # Small feature map: take the full spatial extent and fold batch in.
        tile_hw = hw
        n_blk = int(max(1, min(n, budget_cols // max(hw, 1))))
    else:
        # Large feature map: lane-dense spatial tile (multiple of 128);
        # the ragged last block (if any) is masked by Pallas.
        n_blk = 1
        tile_hw = int(max(128, (budget_cols // 128) * 128))
    # v7x has two TensorCores: keep at least two parallel grid steps.
    if n > 1 and pl.cdiv(n, n_blk) * pl.cdiv(hw, tile_hw) < 2:
        n_blk = int(pl.cdiv(n, 2))
    return n_blk, tile_hw


def net_lin_layer(x, weight, *, target_bytes=8 << 20):
    """x: (N, C_in, H, W); weight: (C_out, C_in, 1, 1) -> (N, C_out, H, W)."""
    N, C_in, H, W = x.shape
    C_out = weight.shape[0]
    assert weight.shape == (C_out, C_in, 1, 1)

    HW = H * W
    w3 = weight.reshape(C_out, C_in, 1)
    x3 = x.reshape(N, C_in, HW)                        # lane-dense last dim

    elem_bytes = jnp.dtype(x.dtype).itemsize
    n_blk, tile_hw = _choose_tiles(N, C_in, C_out, HW, elem_bytes, target_bytes)
    grid = (int(pl.cdiv(N, n_blk)), int(pl.cdiv(HW, tile_hw)))

    w_spec = pl.BlockSpec((C_out, C_in, 1), lambda n, t: (0, 0, 0))
    x_spec = pl.BlockSpec((n_blk, C_in, tile_hw), lambda n, t: (n, 0, t))
    o_spec = pl.BlockSpec((n_blk, C_out, tile_hw), lambda n, t: (n, 0, t))

    cost = pl.CostEstimate(
        flops=2 * N * C_out * C_in * HW,
        transcendentals=0,
        bytes_accessed=(N * C_in * HW + N * C_out * HW) * elem_bytes
        + C_out * C_in * jnp.dtype(weight.dtype).itemsize,
    )

    out3 = pl.pallas_call(
        _netlin_kernel,
        out_shape=jax.ShapeDtypeStruct((N, C_out, HW), x.dtype),
        grid_spec=pltpu.PrefetchScalarGridSpec(
            num_scalar_prefetch=0,
            grid=grid,
            in_specs=[w_spec, x_spec],
            out_specs=o_spec,
        ),
        compiler_params=pltpu.CompilerParams(
            dimension_semantics=("parallel", "parallel"),
            vmem_limit_bytes=32 * 1024 * 1024,
        ),
        cost_estimate=cost,
    )(w3, x3)

    return out3.reshape(N, C_out, H, W)


if __name__ == "__main__":
    key = jax.random.PRNGKey(0)
    k_x, k_w = jax.random.split(key)

    # Small shapes consistent with the module (chn_in channels -> chn_out=1).
    N, C_in, C_out, H, W = 2, 32, 1, 16, 16
    x = jax.random.normal(k_x, (N, C_in, H, W), dtype=jnp.float32)
    weight = jax.random.normal(k_w, (C_out, C_in, 1, 1), dtype=jnp.float32) * 0.1

    out = jax.block_until_ready(net_lin_layer(x, weight))

    # Reference: exact-f32 1x1 conv (no bias), mirroring the PyTorch forward.
    ref = jnp.einsum(
        "oi,nihw->nohw",
        weight.reshape(C_out, C_in),
        x,
        precision=jax.lax.Precision.HIGHEST,
    )

    assert out.shape == (N, C_out, H, W)
    assert jnp.allclose(out, ref, atol=1e-5, rtol=1e-5)
    print("KERNEL_OK")
</pallas_src>

<mosaic_0001>
module attributes {stable_mosaic.version = 11 : i64} {
  func.func @_netlin_kernel(%arg0: i32, %arg1: i32, %arg2: memref<1x32x1xf32, #tpu.memory_space<vmem>>, %arg3: memref<1x32x256xf32, #tpu.memory_space<vmem>>, %arg4: memref<1x1x256xf32, #tpu.memory_space<vmem>>) attributes {dimension_semantics = [#tpu.dimension_semantics<parallel>, #tpu.dimension_semantics<parallel>], iteration_bounds = array<i64: 2, 1>, scalar_prefetch = 0 : i64, scratch_operands = 0 : i64, tpu.core_type = #tpu.core_type<tc>, window_params = [{pipeline_mode = #tpu.pipeline_mode<synchronous>, transform_indices = @transform_0, window_bounds = array<i64: 1, 32, 1>}, {transform_indices = @transform_1, window_bounds = array<i64: 1, 32, 256>}, {transform_indices = @transform_2, window_bounds = array<i64: 1, 1, 256>}]} {
    %c0 = arith.constant 0 : index
    %c0_0 = arith.constant 0 : index
    %c0_1 = arith.constant 0 : index
    %0 = vector.load %arg3[%c0, %c0_0, %c0_1] : memref<1x32x256xf32, #tpu.memory_space<vmem>>, vector<1x32x256xf32>
    %c0_2 = arith.constant 0 : index
    %c0_3 = arith.constant 0 : index
    %c0_4 = arith.constant 0 : index
    %1 = vector.load %arg2[%c0_2, %c0_3, %c0_4] : memref<1x32x1xf32, #tpu.memory_space<vmem>>, vector<1x32x1xf32>
    %2 = vector.broadcast %1 : vector<1x32x1xf32> to vector<1x32x256xf32>
    %3 = arith.mulf %2, %0 : vector<1x32x256xf32>
    %cst = arith.constant dense<0.000000e+00> : vector<1x256xf32>
    %4 = vector.multi_reduction <add>, %3, %cst [1] : vector<1x32x256xf32> to vector<1x256xf32>
    %5 = vector.shape_cast %4 : vector<1x256xf32> to vector<1x1x256xf32>
    %c0_5 = arith.constant 0 : index
    %c0_6 = arith.constant 0 : index
    %c0_7 = arith.constant 0 : index
    %6 = vector.load %arg4[%c0_5, %c0_6, %c0_7] : memref<1x1x256xf32, #tpu.memory_space<vmem>>, vector<1x1x256xf32>
    tpu.vector_store %arg4[%c0_5, %c0_6, %c0_7], %5 {strides = array<i32>} : memref<1x1x256xf32, #tpu.memory_space<vmem>>, vector<1x1x256xf32>,
    return
  }
  func.func @transform_0(%arg0: i32, %arg1: i32) -> (i32, i32, i32) {
    %c0_i32 = arith.constant 0 : i32
    %c0_i32_0 = arith.constant 0 : i32
    %c0_i32_1 = arith.constant 0 : i32
    %c0_i32_2 = arith.constant 0 : i32
    return %c0_i32, %c0_i32_0, %c0_i32_1 : i32, i32, i32
  }
  func.func @transform_1(%arg0: i32, %arg1: i32) -> (i32, i32, i32) {
    %c0_i32 = arith.constant 0 : i32
    %c0_i32_0 = arith.constant 0 : i32
    return %arg0, %c0_i32, %arg1 : i32, i32, i32
  }
  func.func @transform_2(%arg0: i32, %arg1: i32) -> (i32, i32, i32) {
    %c0_i32 = arith.constant 0 : i32
    %c0_i32_0 = arith.constant 0 : i32
    return %arg0, %c0_i32, %arg1 : i32, i32, i32
  }
}

</mosaic_0001>

<bundles_post_ra>
// kernel: tpu_custom_call.1
= control target key start
LH: loop header
LB: loop body
LE: loop exit
PB: predicated region body
PF: predicated region fallthrough
CT: control target
= control target key end

     0   :  { %7 = vsyncpa [#allocation3], 0  ;;  %s770_s0 = inlined_call_operand.vmem [shape: f32[1,32,1], index: 0, kind: input, shape index: {}]   ;;  %s771_s1 = inlined_call_operand.hbm [shape: f32[2,32,256], index: 1, kind: input, shape index: {}]   ;;  %s772_s2 = inlined_call_operand.hbm [shape: f32[2,1,256], index: 2, kind: output, shape index: {}]  }
   0x1   :  { %9 = vsyncpa [#allocation3 + $0x1], 0 }
   0x2   :  { %10 = vsyncpa [#allocation4], 0 }
   0x3   :  { %12 = vsyncpa [#allocation4 + $0x1], 0  ;;  %s584_s9 = smov 0   ;;  %s586_s10 = smov 0  }
   0x4   :  { %s588_s11 = smov 0   ;;  %s590_s12 = smov 0  }
   0x5   :  { %s592_s13 = smov 0   ;;  %s594_s14 = smov 0  }
   0x6 LB: > { %s364_s15 = sadd.s32 4294967295, %s561_s14   ;;  %s365_s16 = sadd.s32 4294967294, %s561_s14   ;;  %s561_s14 = sphi %s594_s14, %s18_s14   ;;  %s557_s13 = sphi %s592_s13, %s787_s13   ;;  %s553_s12 = sphi %s590_s12, %s786_s12   ;;  %s549_s11 = sphi %s588_s11, %s785_s11   ;;  %s545_s10 = sphi %s586_s10, %s784_s10   ;;  %s541_s9 = sphi %s584_s9, %s783_s9  }
   0x7   : > { %s30_s17 = sadd.s32 1, %s557_s13  ;;  %s60_s18 = sadd.s32 1, %s549_s11 }
   0x8   : > { %p32_p0 = scmp.ge.s32.totalorder %s30_s17, 2  ;;  %p67_p1 = scmp.ne.s32.totalorder %s549_s11, %s545_s10 }
   0x9   : > { %p68_p2 = scmp.eq.s32.totalorder %s561_s14, 0  ;;  %p73_p3 = scmp.ne.s32.totalorder %s545_s10, %s541_s9 }
   0xa   : > { %s789_s17 = smov (%p32_p0, %s30_s17), 0  ;;  %p74_p5 = scmp.eq.s32.totalorder %s364_s15, 0 }
   0xb   : > { %p625_p4 = por %p68_p2, %p67_p1  ;;  %s55_s20 = ssub.s32 %s557_s13, %s789_s17 }
   0xc   : > { %p99_p6 = scmp.eq.s32.totalorder %s364_s15, 1  ;;  %p58_p7 = scmp.eq.s32.totalorder %s55_s20, 0 }
   0xd   : > { %p631_p8 = por %p74_p5, %p73_p3  ;;  %p105_p10 = scmp.eq.s32.totalorder %s365_s16, 1 }
   0xe   : > { %p635_p9 = por %p99_p6, %p67_p1  ;;  %p393_p13 = scmp.lt.s32.totalorder %s561_s14, 2 }
   0xf   : > { %s640_s23 = scalar_select %p58_p7, %s549_s11, %s60_s18  }
  0x10   : > { %s776_s22 = scalar_select %p635_p9, 1, 0 }
  0x11   : > { %p642_p11 = por %p105_p10, %p73_p3  ;;  %s128_s25 = sand.u32 1, %s549_s11  }
  0x12   : > { %s368_s26 = sshll.u32 %s128_s25, 6  ;;  %s379_s27 = sshll.u32 %s557_s13, 10 }
  0x13   : > { %s777_s24 = scalar_select %p642_p11, 1, 0 }
  0x14   : > { %s653_s30 = scalar_lea.hbm %s771_s1, %s379_s27  ;;  %s132_s3 = scalar_lea.vmem [#allocation2], %s368_s26 }
  0x15   : > { %s141_s4 = sshll.u32 %s132_s3, 4  ;;  %p659_p0 = pnand %p393_p13, %p625_p4  ;;  %s655_s4 = int_to_ptr.vmem [resolvable:$true] %s141_s4 }
  0x16   : > { %s664_s6 = scalar_lea.sflag [#allocation3], %s128_s25  ;;  %s449_s7 = scalar_lea.hbm %s653_s30, 1024 }
  0x17   : > { %p450_p2 = scmp.ne.s32.totalorder %s653_s30, %s449_s7  ;;  %p451_p3 = pneg %p659_p0 }
  0x18   : > { %s454_s16 = scalar_lea.hbm %s771_s1, 2048  ;;  %p455_p4 = scmp.lt.u32.totalorder %s653_s30, %s771_s1 }
  0x19   : > { %p452_p5 = pnand %p451_p3, %p450_p2  ;;  %p456_p7 = scmp.lt.u32.totalorder %s454_s16, %s449_s7 }
  0x1a   : > { %p458_p13 = scmp.lt.u32.totalorder %s449_s7, %s653_s30 }
  0x1b   : > { %p453_p6 = pneg %p452_p5  ;;  %p457_p10 = por %p456_p7, %p455_p4 }
  0x1d   : > { %p459_p12 = por %p458_p13, %p457_p10 }
  0x1f   : > { %p460_p1 = pnand %p459_p12, %p453_p6 }
  0x21   : > { %463 = shalt.err (!%p460_p1)
}
  0x22   : > { %s464_s20 = scalar_lea.vmem %s655_s4, 1024  ;;  %s563_s25 = smov [#allocation2]  }
  0x23   : > { %p465_p2 = scmp.ne.s32.totalorder %s655_s4, %s464_s20  ;;  %s469_s26 = sshll.u32 %s563_s25, 4  ;;  %s470_s26 = int_to_ptr.vmem [resolvable:$false] %s469_s26 }
  0x24   : > { %s471_s27 = scalar_lea.vmem %s470_s26, 2048  ;;  %p472_p9 = scmp.lt.s32.totalorder %s655_s4, %s470_s26 }
  0x25   : > { %p467_p5 = pnand %p465_p2, %p451_p3  ;;  %p473_p4 = scmp.lt.s32.totalorder %s471_s27, %s464_s20 }
  0x27   : > { %p468_p11 = pneg %p467_p5  ;;  %p474_p7 = por %p473_p4, %p472_p9 }
  0x29   : > { %p475_p10 = pnand %p474_p7, %p468_p11 }
  0x2b   : > { %478 = shalt.err (!%p475_p10)
}
  0x2c   : > { %s564_s28 = smov 256   ;;  %s565_s29 = smov 16  }
  0x2d   : > { %388 = dma.hbm_to_vmem [thread:$0]  (!%p659_p0), %s653_s30, 1024, %s655_s4, %s664_s6, %s564_s28, %s564_s28, %s565_s29  }
  0x2e   : > { %p149_p12 = scmp.lt.s32.totalorder %s561_s14, 3  ;;  %p779_p1 = scmp.ge.s32.totalorder %s561_s14, 1 }
  0x30   : > { %p150_p3 = pnand %p779_p1, %p149_p12 }
  0x31   : > { %s696_s3 = sand.u32 (!%p150_p3), 1, %s545_s10  }
  0x32   : > { %153 = sbr.rel (%p150_p3) target bundleno = 232 (0xe8), region = 28  ;;  %s372_s7 = sshll.u32 (!%p150_p3), %s696_s3, 6 }
  0x33   : > { %s156_s8 = scalar_lea.sflag (!%p150_p3), [#allocation3], %s696_s3  ;;  %s159_s15 = scalar_lea.vmem (!%p150_p3), [#allocation2], %s372_s7 }
  0x39   : > { %532 = dma.done.wait (%p631_p8), %s156_s8, 1024  }
  0x3a   : > { %534 = vsyncadd (%p631_p8), %s156_s8, 4294966272  ;;  %v566_v0 = vmov 0   ;;  %v192_v1 = vld [vmem:[%s770_s0 + $0x10] sm:$0xff]  ;;  %v190_v2 = vld [vmem:[%s770_s0] sm:$0xff]  ;;  %v567_v35 = vmov 1966171168   ;;  %v246_v37 = vlaneseq }
  0x3b   : > { %448 = vset.pattern.permute.xlu1 %v566_v0  ;;  %447 = vset.pattern.permute.xlu0 %v566_v0  ;;  %v193_v3 = vld [vmem:[%s770_s0 + $0x18] sm:$0xff]  ;;  %v191_v4 = vld [vmem:[%s770_s0 + $0x8] sm:$0xff]  ;;  %v182_v7 = vld [vmem:[%s159_s15] sm:$0xff]  ;;  %v244_v36 = vunpack.c.l.s4 %v567_v35  ;;  %s373_s20 = sshll.u32 %s696_s3, 1  ;;  %s380_s25 = sshll.u32 %s553_s12, 5 }
  0x3c   : > { %206 = vperm.xlu1 %448, %v192_v1   ;;  %196 = vperm.xlu0 %447, %v190_v2   ;;  %v183_v8 = vld [vmem:[%s159_s15 + $0x8] sm:$0xff]  ;;  %v184_v9 = vld [vmem:[%s159_s15 + $0x10] sm:$0xff]  ;;  %v185_v10 = vld [vmem:[%s159_s15 + $0x18] sm:$0xff]  ;;  %v247_v43 = vshrl.u32 %v246_v37, 7  ;;  %s179_s26 = scalar_lea.vmem [#allocation5], %s373_s20  ;;  %vm260_vm0 = vcmp.lt.s32.totalorder %v246_v37, 256  ;;  %s721_s7 = scalar_lea.hbm %s772_s2, %s380_s25 }
  0x3d   : > { %v186_v11 = vld [vmem:[%s159_s15 + $0x20] sm:$0xff]  ;;  %v187_v12 = vld [vmem:[%s159_s15 + $0x28] sm:$0xff]  ;;  %v188_v19 = vld [vmem:[%s159_s15 + $0x30] sm:$0xff]  ;;  %v245_v42 = vunpack.c.0.s8 %v244_v36  ;;  %s280_s27 = sshll.u32 %s179_s26, 4  ;;  %s264_s8 = scalar_lea.sflag [#allocation4], %s696_s3  ;;  %s723_s27 = int_to_ptr.vmem [resolvable:$true] %s280_s27 }
  0x3e   : > { %v189_v20 = vld [vmem:[%s159_s15 + $0x38] sm:$0xff]  ;;  %s479_s15 = scalar_lea.vmem %s723_s27, 32  ;;  %p780_p9 = scmp.ne.s32.totalorder %s776_s22, 0 }
  0x3f   : > { %v248_v48 = vsub.s32 %v245_v42, %v247_v43  ;;  %p480_p8 = scmp.ne.s32.totalorder %s723_s27, %s479_s15  ;;  %s568_s12 = smov [#allocation5]  }
  0x40   : > { %211 = vperm.xlu1 %448, %v193_v3   ;;  %201 = vperm.xlu0 %447, %v191_v4   ;;  %s483_s30 = sshll.u32 %s568_s12, 4  ;;  %s484_s30 = int_to_ptr.vmem [resolvable:$false] %s483_s30 }
  0x41   : > { %p481_p11 = pnand %p480_p8, %p780_p9  ;;  %s485_s4 = scalar_lea.vmem %s484_s30, 64 }
  0x42   : > { %p486_p6 = scmp.lt.s32.totalorder %s723_s27, %s484_s30  ;;  %p487_p13 = scmp.lt.s32.totalorder %s485_s4, %s479_s15 }
  0x43   : > { %p482_p0 = pneg %p481_p11 }
  0x44   : > { %p488_p2 = por %p487_p13, %p486_p6 }
  0x46   : > { %p489_p5 = pnand %p488_p2, %p482_p0 }
  0xbb   : > { %v207_v5 = vpop.permute.xlu1 %206  ;;  %v197_v6 = vpop.permute.xlu0 %196 }
  0xbc   : > { %v214_v14 = vmul.f32 %v197_v6, %v182_v7  ;;  %v215_v15 = vmul.f32 %v197_v6, %v183_v8  ;;  %v218_v21 = vmul.f32 %v207_v5, %v186_v11  ;;  %v219_v22 = vmul.f32 %v207_v5, %v187_v12 }
  0xbf   : > { %v202_v13 = vpop.permute.xlu0 %201  ;;  %v212_v18 = vpop.permute.xlu1 %211 }
  0xc0   : > { %v216_v16 = vmul.f32 %v202_v13, %v184_v9  ;;  %v217_v17 = vmul.f32 %v202_v13, %v185_v10  ;;  %v220_v25 = vmul.f32 %v212_v18, %v188_v19  ;;  %v221_v26 = vmul.f32 %v212_v18, %v189_v20 }
  0xc2   : > { %v222_v23 = vadd.f32 %v216_v16, %v214_v14  ;;  %v231_v24 = vadd.f32 %v217_v17, %v215_v15 }
  0xc4   : > { %v223_v27 = vadd.f32 %v222_v23, %v218_v21  ;;  %v232_v28 = vadd.f32 %v231_v24, %v219_v22 }
  0xc6   : > { %v224_v29 = vadd.f32 %v223_v27, %v220_v25  ;;  %v233_v30 = vadd.f32 %v232_v28, %v221_v26 }
  0xc8   : > { %v225_v31 = vrot.slane %v224_v29, 4  ;;  %v234_v32 = vrot.slane %v233_v30, 4 }
  0xca   : > { %v226_v33 = vadd.f32 %v225_v31, %v224_v29  ;;  %v235_v34 = vadd.f32 %v234_v32, %v233_v30 }
  0xcc   : > { %v227_v38 = vrot.slane %v226_v33, 2  ;;  %v236_v39 = vrot.slane %v235_v34, 2 }
  0xce   : > { %v228_v40 = vadd.f32 %v227_v38, %v226_v33  ;;  %v237_v41 = vadd.f32 %v236_v39, %v235_v34 }
  0xd0   : > { %v229_v44 = vrot.slane %v228_v40, 1  ;;  %v238_v45 = vrot.slane %v237_v41, 1 }
  0xd2   : > { %v230_v46 = vadd.f32 %v229_v44, %v228_v40  ;;  %v239_v47 = vadd.f32 %v238_v45, %v237_v41 }
  0xd4   : > { %v242_v49 = vcombine.low %v230_v46, %v239_v47 }
  0xd6   : > { %v249_v50 = vrot.slane %v242_v49, %v248_v48 }
  0xd8   : > { %v256_v51 = vrot.slane %v249_v50, %v248_v48 }
  0xda   : > { %262 = vst.msk [vmem:[%s179_s26] sm:$0x3] %vm260_vm0, %v256_v51 }
  0xdb   : > { %492 = shalt.err (!%p489_p5)
}
  0xdc   : > { %s493_s3 = scalar_lea.hbm %s721_s7, 32  ;;  %s497_s16 = scalar_lea.hbm %s772_s2, 64 }
  0xdd   : > { %p494_p4 = scmp.ne.s32.totalorder %s721_s7, %s493_s3  ;;  %p498_p12 = scmp.lt.u32.totalorder %s721_s7, %s772_s2 }
  0xde   : > { %p499_p1 = scmp.lt.u32.totalorder %s497_s16, %s493_s3  ;;  %p501_p8 = scmp.lt.u32.totalorder %s493_s3, %s721_s7 }
  0xdf   : > { %p495_p7 = pnand %p494_p4, %p780_p9 }
  0xe0   : > { %p500_p3 = por %p499_p1, %p498_p12 }
  0xe1   : > { %p496_p10 = pneg %p495_p7 }
  0xe2   : > { %p502_p11 = por %p501_p8, %p500_p3 }
  0xe4   : > { %p503_p0 = pnand %p502_p11, %p496_p10 }
  0xe6   : > { %506 = shalt.err (!%p503_p0)
}
  0xe7   : > { %383 = dma.vmem_to_hbm [thread:$0]  (%p780_p9), %s723_s27, 32, %s721_s7, %s264_s8  }
  0xe8 PF: > { %s292_s21 = sand.u32 1, %s541_s9   ;;  %p781_p6 = scmp.ne.s32.totalorder %s777_s24, 0 }
  0xe9   : > { %p782_p13 = scmp.ge.s32.totalorder %s561_s14, 2  ;;  %s293_s20 = scalar_lea.sflag [#allocation4], %s292_s21 }
  0xeb   : > { %p390_p2 = pnand %p782_p13, %p781_p6 }
  0xed   : > { %536 = dma.done.wait (!%p390_p2), %s293_s20, 32  }
  0xee   : > { %538 = vsyncadd (!%p390_p2), %s293_s20, 4294967264  ;;  %s18_s14 = sadd.s32 1, %s561_s14   ;;  %s783_s9 = smov %s545_s10 }
  0xef   : > { %p15_p5 = scmp.ge.s32.totalorder %s18_s14, 4   ;;  %s784_s10 = smov %s549_s11 }
  0xf0   : > { %s785_s11 = smov %s640_s23  ;;  %s786_s12 = smov %s557_s13 }
  0xf1   : > { %s787_s13 = smov %s789_s17  ;;  %17 = sbr.rel (!%p15_p5) target bundleno = 6 (0x6), region = 73 }
  0xf8   :  { %298 = vsyncpa [#allocation3], 1 }
  0xf9   :  { %300 = vsyncpa [#allocation3 + $0x1], 1 }
  0xfa   :  { %301 = vsyncpa [#allocation4], 1 }
  0xfb   :  { %303 = vsyncpa [#allocation4 + $0x1], 1 }

</bundles_post_ra>
